<compile_context>
chip_gen: v7x
topology: tpu7x:2x2x1
jax: 0.10.0
libtpu: 0.0.40
codegen_flags: <defaults>
</compile_context>

<pallas_src>
import functools

import numpy as np

import jax
import jax.numpy as jnp
from jax import lax
from jax.experimental import pallas as pl
from jax.experimental.pallas import tpu as pltpu

_EPS = 1e-8  # nn.CosineSimilarity eps (clamped per row norm here; identical for
             # non-degenerate inputs, differs from torch only for ~zero vectors)


def _vmem_limit_bytes():
    """Per-generation VMEM budget instead of a hard-coded constant."""
    try:
        cap = int(pltpu.get_tpu_info().vmem_capacity_bytes)
        return max(32 * 1024 * 1024, (cap * 3) // 4)
    except Exception:
        return 48 * 1024 * 1024


# --------------------------------------------------------------------------- #
# K1: row-normalize + fold 1/sqrt(temperature)                                 #
# --------------------------------------------------------------------------- #
def _normalize_kernel(x_ref, o_ref, *, scale, eps):
    x = x_ref[...].astype(jnp.float32)
    sq = jnp.sum(x * x, axis=1, keepdims=True)
    inv = lax.rsqrt(jnp.maximum(sq, eps * eps)) * scale   # EUP rsqrt, no divide
    o_ref[...] = x * inv


def _normalize(reps, scale, vmem_limit):
    n, d = reps.shape
    if n % 8 != 0 or n <= 8:
        tr = n
    else:
        budget = max(1 << 20, vmem_limit // 8)
        tr = (budget // (16 * d)) // 8 * 8                # in+out, double buffered
        tr = int(max(8, min(512, tr, n)))
    return pl.pallas_call(
        functools.partial(_normalize_kernel, scale=scale, eps=_EPS),
        out_shape=jax.ShapeDtypeStruct((n, d), jnp.float32),
        grid=(pl.cdiv(n, tr),),
        in_specs=[pl.BlockSpec((tr, d), lambda i: (i, 0))],
        out_specs=pl.BlockSpec((tr, d), lambda i: (i, 0)),
        compiler_params=pltpu.CompilerParams(
            dimension_semantics=("parallel",),
            vmem_limit_bytes=vmem_limit),
    )(reps)


# --------------------------------------------------------------------------- #
# K2: MXU shifted similarities fused with the regrouped-softmax reductions     #
# --------------------------------------------------------------------------- #
def _simcols_kernel(a_ref, b1_ref, b2_ref, thr_ref, out_ref, *,
                    tile, m, nbits, nslots):
    """One (shift-block l, anchor-block i) tile.

    C = A @ [B1;B2]^T on the MXU; V[dj, ds] = C[dj, dj+ds] via static staggered
    rolls; then exp + masked per-shift column reductions accumulate into the
    (nslots, tile) output block that stays resident across the anchor axis i.
    """
    i = pl.program_id(1)

    a = a_ref[...]                                            # (T, D)
    dn = (((1,), (1,)), ((), ()))                             # contract last dims
    c1 = lax.dot_general(a, b1_ref[...], dn, preferred_element_type=jnp.float32)
    c2 = lax.dot_general(a, b2_ref[...], dn, preferred_element_type=jnp.float32)
    c = jnp.concatenate([c1, c2], axis=1)                     # (T, 2T)

    # Staggered relayout: roll row dj left by dj (log trick, static shifts).
    rows = lax.broadcasted_iota(jnp.int32, c.shape, 0)
    for b in range(nbits):
        sh = 1 << b
        rolled = jnp.concatenate([c[:, sh:], c[:, :sh]], axis=1)
        c = jnp.where(((rows >> b) & 1) == 1, rolled, c)
    v = c[:, :tile]                                           # (T, T) = cos / T

    # Safe-softmax offset m = 1/temperature bounds every logit from above.
    # (Assumes temperature is not pathologically tiny, > ~0.03 in f32.)
    e = jnp.exp(v - m)
    jglob = i * tile + lax.broadcasted_iota(jnp.int32, (tile, tile), 0)

    @pl.when(i == 0)
    def _init():
        out_ref[...] = jnp.zeros_like(out_ref)

    for k in range(nslots):
        thr = thr_ref[k, :]                                   # (T,) thresholds
        contrib = jnp.sum(jnp.where(jglob < thr, e, 0.0), axis=0)
        out_ref[k, :] = out_ref[k, :] + contrib


def _shifted_colsums(xs, thresh, *, tile, nslots, m, vmem_limit):
    n, d = xs.shape
    nb = n // tile
    nbits = (tile - 1).bit_length()
    return pl.pallas_call(
        functools.partial(_simcols_kernel, tile=tile, m=m, nbits=nbits,
                          nslots=nslots),
        out_shape=jax.ShapeDtypeStruct((nslots, n), jnp.float32),
        grid=(nb, nb),                                        # (shift, anchor)
        in_specs=[
            pl.BlockSpec((tile, d), lambda l, i: (i, 0)),
            pl.BlockSpec((tile, d), lambda l, i: ((i + l) % nb, 0)),
            pl.BlockSpec((tile, d), lambda l, i: ((i + l + 1) % nb, 0)),
            pl.BlockSpec((nslots, tile), lambda l, i: (0, l)),
        ],
        out_specs=pl.BlockSpec((nslots, tile), lambda l, i: (0, l)),
        compiler_params=pltpu.CompilerParams(
            dimension_semantics=("parallel", "arbitrary"),
            vmem_limit_bytes=vmem_limit),
    )(xs, xs, xs, thresh)


def _pick_tile(n, d, vmem_limit):
    def fits(t):
        operands = 3 * t * d * 4 * 2             # A, B1, B2 double buffered
        interm = 8 * t * t * 4                   # C + rolled copy + V/E/masks
        return operands + interm <= vmem_limit // 2

    if n >= 512 and n % 256 == 0 and fits(256):
        return 256
    if n % 128 == 0:
        return 128
    # TODO(synk): for large N that is not a multiple of 128 (or huge D), add a
    # column/K-tiled fallback; the single full-size tile below assumes the
    # whole problem fits in VMEM.
    return n


# --------------------------------------------------------------------------- #
# Compile-time tables for torch's row-major negative regrouping                #
# --------------------------------------------------------------------------- #
def _build_regroup_tables(n, bsz):
    """Negative rows (shifts) in reference order: s_r = r+1 (r < B-1) else r+2.
    Flat position p = r*N + j; anchor a owns p in [a*(N-2), (a+1)*(N-2)).
    Each chunk sum is assembled from per-shift exp column sums and prefix
    partial sums at <=3 compile-time thresholds."""
    chunk = n - 2

    def shift_of(r):
        return r + 1 if r < bsz - 1 else r + 2

    col_slots = [dict() for _ in range(n)]       # column -> {threshold: slot}
    sym_terms = []
    for a in range(n):
        lo = a * chunk
        r0, c0 = divmod(lo, n)
        s1 = shift_of(r0)
        if c0 + chunk <= n:                      # chunk fits in one neg row
            terms = [(1.0, s1, c0 + chunk), (-1.0, s1, c0)]
        else:                                    # spills into the next neg row
            s2 = shift_of(r0 + 1)
            terms = [(1.0, s1, n), (-1.0, s1, c0), (1.0, s2, c0 - 2)]
        for _, col, c in terms:
            if 0 < c < n:
                col_slots[col].setdefault(c, len(col_slots[col]))
        sym_terms.append(terms)

    n_extra = max(len(dct) for dct in col_slots)
    nslots = n_extra + 1                         # last row = full column sum
    colsum_row = nslots - 1
    thresh = np.zeros((nslots, n), dtype=np.int32)
    thresh[colsum_row, :] = n
    for col, dct in enumerate(col_slots):
        for c, slot in dct.items():
            thresh[slot, col] = c

    idx = np.zeros((3, n), dtype=np.int32)
    coef = np.zeros((3, n), dtype=np.float32)
    for a, terms in enumerate(sym_terms):
        for k, (cf, col, c) in enumerate(terms):
            if c <= 0:
                continue                         # empty partial sum -> 0
            slot = colsum_row if c >= n else col_slots[col][c]
            idx[k, a] = slot * n + col
            coef[k, a] = cf
    return thresh, idx, coef, nslots


# --------------------------------------------------------------------------- #
# Wrapper (forward pass of NTCrossEntropyLoss)                                 #
# --------------------------------------------------------------------------- #
def nt_cross_entropy_loss(rep1, rep2, *, temperature, batch_size):
    bsz = int(batch_size)
    n = 2 * bsz
    if n <= 2:                                   # no negatives -> CE over 1 class
        return jnp.float32(0.0)
    d = int(rep1.shape[-1])
    vmem_limit = _vmem_limit_bytes()
    inv_t = float(1.0 / temperature)
    scale = float(1.0 / float(temperature) ** 0.5)

    reps = jnp.concatenate([rep1, rep2], axis=0).astype(jnp.float32)

    # K1: unit-normalize rows, folding 1/temperature as 1/sqrt(T) per operand.
    xs = _normalize(reps, scale, vmem_limit)

    # Positives: pos[a] = <xs[a], xs[(a+B) % N]> = cos/T  (O(N*D), plain JAX).
    pos = jnp.sum(xs * jnp.roll(xs, -bsz, axis=0), axis=1)

    # K2: MXU shifted similarities + fused regrouped-softmax partial sums.
    thresh_np, idx_np, coef_np, nslots = _build_regroup_tables(n, bsz)
    tile = _pick_tile(n, d, vmem_limit)
    parts = _shifted_colsums(xs, jnp.asarray(thresh_np), tile=tile,
                             nslots=nslots, m=inv_t, vmem_limit=vmem_limit)

    # O(N) assembly of the per-anchor negative chunk sums (torch regrouping).
    vals = parts.reshape(-1)[jnp.asarray(idx_np)]             # (3, N)
    neg_sum = jnp.sum(jnp.asarray(coef_np) * vals, axis=0)    # (N,)

    lse = inv_t + jnp.log(jnp.exp(pos - inv_t) + neg_sum)
    return jnp.sum(lse - pos) / n


# --------------------------------------------------------------------------- #
# NumPy mirror of the torch module (numerical sanity check only)               #
# --------------------------------------------------------------------------- #
def _reference_loss_np(rep1, rep2, temperature, batch_size):
    n = 2 * batch_size
    reps = np.concatenate([rep1, rep2], axis=0).astype(np.float64)
    norms = np.linalg.norm(reps, axis=1)
    cos = (reps @ reps.T) / np.maximum(np.outer(norms, norms), _EPS)
    j = np.arange(n)
    sims = cos[j[None, :], (j[None, :] + j[:, None]) % n]     # sims[i, j]
    pos = sims[batch_size].reshape(n, 1)
    keep = [i for i in range(n) if i not in (0, batch_size)]
    neg = sims[keep].reshape(n, n - 2)
    logits = np.concatenate([pos, neg], axis=1) / temperature
    mx = logits.max(axis=1, keepdims=True)
    lse = mx[:, 0] + np.log(np.exp(logits - mx).sum(axis=1))
    return float(np.sum(lse - logits[:, 0]) / n)


if __name__ == "__main__":
    def run_case(batch_size, feat, temperature):
        key = jax.random.PRNGKey(0)
        k1, k2 = jax.random.split(key)
        rep1 = jax.random.normal(k1, (batch_size, feat), dtype=jnp.float32)
        rep2 = jax.random.normal(k2, (batch_size, feat), dtype=jnp.float32)
        fn = jax.jit(functools.partial(nt_cross_entropy_loss,
                                       temperature=temperature,
                                       batch_size=batch_size))
        out = fn(rep1, rep2)
        jax.block_until_ready(out)
        ref = _reference_loss_np(np.asarray(rep1), np.asarray(rep2),
                                 temperature, batch_size)
        assert abs(float(out) - ref) < 2e-3, (batch_size, feat, float(out), ref)

    run_case(4, 32, 0.5)     # tiny single-tile path (T == N)
    run_case(128, 96, 0.5)   # MXU-tiled path: T=128, 2x2 grid, wrapped blocks
    print("KERNEL_OK")
</pallas_src>

<mosaic_0001>
module attributes {stable_mosaic.version = 11 : i64} {
  func.func @_normalize_kernel(%arg0: i32, %arg1: memref<8x32xf32, #tpu.memory_space<vmem>>, %arg2: memref<8x32xf32, #tpu.memory_space<vmem>>) attributes {dimension_semantics = [#tpu.dimension_semantics<parallel>], iteration_bounds = array<i64: 1>, scalar_prefetch = 0 : i64, scratch_operands = 0 : i64, tpu.core_type = #tpu.core_type<tc>, window_params = [{transform_indices = @transform_0, window_bounds = array<i64: 8, 32>}, {transform_indices = @transform_1, window_bounds = array<i64: 8, 32>}]} {
    %c0 = arith.constant 0 : index
    %c0_0 = arith.constant 0 : index
    %0 = vector.load %arg1[%c0, %c0_0] : memref<8x32xf32, #tpu.memory_space<vmem>>, vector<8x32xf32>
    %1 = arith.mulf %0, %0 : vector<8x32xf32>
    %cst = arith.constant dense<0.000000e+00> : vector<8xf32>
    %2 = vector.multi_reduction <add>, %1, %cst [1] : vector<8x32xf32> to vector<8xf32>
    %3 = vector.shape_cast %2 : vector<8xf32> to vector<8x1xf32>
    %cst_1 = arith.constant 1.000000e-16 : f32
    %4 = vector.broadcast %cst_1 : f32 to vector<8x1xf32>
    %5 = arith.maximumf %3, %4 : vector<8x1xf32>
    %6 = math.rsqrt %5 : vector<8x1xf32>
    %cst_2 = arith.constant 1.41421354 : f32
    %7 = vector.broadcast %cst_2 : f32 to vector<8x1xf32>
    %8 = arith.mulf %6, %7 : vector<8x1xf32>
    %9 = vector.broadcast %8 : vector<8x1xf32> to vector<8x32xf32>
    %10 = arith.mulf %0, %9 : vector<8x32xf32>
    %c0_3 = arith.constant 0 : index
    %c0_4 = arith.constant 0 : index
    %11 = vector.load %arg2[%c0_3, %c0_4] : memref<8x32xf32, #tpu.memory_space<vmem>>, vector<8x32xf32>
    tpu.vector_store %arg2[%c0_3, %c0_4], %10 {strides = array<i32>} : memref<8x32xf32, #tpu.memory_space<vmem>>, vector<8x32xf32>,
    return
  }
  func.func @transform_0(%arg0: i32) -> (i32, i32) {
    %c0_i32 = arith.constant 0 : i32
    %c0_i32_0 = arith.constant 0 : i32
    return %arg0, %c0_i32 : i32, i32
  }
  func.func @transform_1(%arg0: i32) -> (i32, i32) {
    %c0_i32 = arith.constant 0 : i32
    %c0_i32_0 = arith.constant 0 : i32
    return %arg0, %c0_i32 : i32, i32
  }
}

module attributes {stable_mosaic.version = 11 : i64} {
  func.func @_simcols_kernel(%arg0: i32, %arg1: i32, %arg2: memref<8x32xf32, #tpu.memory_space<vmem>>, %arg3: memref<8x32xf32, #tpu.memory_space<vmem>>, %arg4: memref<8x32xf32, #tpu.memory_space<vmem>>, %arg5: memref<2x8xi32, #tpu.memory_space<vmem>>, %arg6: memref<2x8xf32, #tpu.memory_space<vmem>>) attributes {dimension_semantics = [#tpu.dimension_semantics<parallel>, #tpu.dimension_semantics<arbitrary>], iteration_bounds = array<i64: 1, 1>, scalar_prefetch = 0 : i64, scratch_operands = 0 : i64, tpu.core_type = #tpu.core_type<tc>, window_params = [{transform_indices = @transform_0, window_bounds = array<i64: 8, 32>}, {transform_indices = @transform_1, window_bounds = array<i64: 8, 32>}, {transform_indices = @transform_2, window_bounds = array<i64: 8, 32>}, {transform_indices = @transform_3, window_bounds = array<i64: 2, 8>}, {transform_indices = @transform_4, window_bounds = array<i64: 2, 8>}]} {
    %c0 = arith.constant 0 : index
    %c0_0 = arith.constant 0 : index
    %0 = vector.load %arg2[%c0, %c0_0] : memref<8x32xf32, #tpu.memory_space<vmem>>, vector<8x32xf32>
    %c0_1 = arith.constant 0 : index
    %c0_2 = arith.constant 0 : index
    %1 = vector.load %arg3[%c0_1, %c0_2] : memref<8x32xf32, #tpu.memory_space<vmem>>, vector<8x32xf32>
    %cst = arith.constant dense<0.000000e+00> : vector<8x8xf32>
    %2 = tpu.matmul %0, %1, %cst {dimension_numbers = #tpu.dot_dimension_numbers<[1], [1], [0], [0], [0, 0, 1, 0], [], []>} : vector<8x32xf32>, vector<8x32xf32>, vector<8x8xf32> -> vector<8x8xf32>
    %c0_3 = arith.constant 0 : index
    %c0_4 = arith.constant 0 : index
    %3 = vector.load %arg4[%c0_3, %c0_4] : memref<8x32xf32, #tpu.memory_space<vmem>>, vector<8x32xf32>
    %cst_5 = arith.constant dense<0.000000e+00> : vector<8x8xf32>
    %4 = tpu.matmul %0, %3, %cst_5 {dimension_numbers = #tpu.dot_dimension_numbers<[1], [1], [0], [0], [0, 0, 1, 0], [], []>} : vector<8x32xf32>, vector<8x32xf32>, vector<8x8xf32> -> vector<8x8xf32>
    %5 = tpu.concatenate %2, %4 in 1 : vector<8x8xf32>, vector<8x8xf32> -> vector<8x16xf32>
    %6 = tpu.iota {dimensions = array<i32: 0>} : vector<8x16xi32>
    %7 = vector.extract_strided_slice %5 {offsets = [0, 1], sizes = [8, 15], strides = [1, 1]} : vector<8x16xf32> to vector<8x15xf32>
    %8 = vector.extract_strided_slice %5 {offsets = [0, 0], sizes = [8, 1], strides = [1, 1]} : vector<8x16xf32> to vector<8x1xf32>
    %9 = tpu.concatenate %7, %8 in 1 : vector<8x15xf32>, vector<8x1xf32> -> vector<8x16xf32>
    %c0_i32 = arith.constant 0 : i32
    %10 = vector.broadcast %c0_i32 : i32 to vector<8x16xi32>
    %11 = arith.shrsi %6, %10 : vector<8x16xi32>
    %c1_i32 = arith.constant 1 : i32
    %12 = vector.broadcast %c1_i32 : i32 to vector<8x16xi32>
    %13 = arith.andi %11, %12 : vector<8x16xi32>
    %c1_i32_6 = arith.constant 1 : i32
    %14 = vector.broadcast %c1_i32_6 : i32 to vector<8x16xi32>
    %15 = arith.cmpi eq, %13, %14 : vector<8x16xi32>
    %16 = arith.select %15, %9, %5 : vector<8x16xi1>, vector<8x16xf32>
    %17 = vector.extract_strided_slice %16 {offsets = [0, 2], sizes = [8, 14], strides = [1, 1]} : vector<8x16xf32> to vector<8x14xf32>
    %18 = vector.extract_strided_slice %16 {offsets = [0, 0], sizes = [8, 2], strides = [1, 1]} : vector<8x16xf32> to vector<8x2xf32>
    %19 = tpu.concatenate %17, %18 in 1 : vector<8x14xf32>, vector<8x2xf32> -> vector<8x16xf32>
    %c1_i32_7 = arith.constant 1 : i32
    %20 = vector.broadcast %c1_i32_7 : i32 to vector<8x16xi32>
    %21 = arith.shrsi %6, %20 : vector<8x16xi32>
    %c1_i32_8 = arith.constant 1 : i32
    %22 = vector.broadcast %c1_i32_8 : i32 to vector<8x16xi32>
    %23 = arith.andi %21, %22 : vector<8x16xi32>
    %c1_i32_9 = arith.constant 1 : i32
    %24 = vector.broadcast %c1_i32_9 : i32 to vector<8x16xi32>
    %25 = arith.cmpi eq, %23, %24 : vector<8x16xi32>
    %26 = arith.select %25, %19, %16 : vector<8x16xi1>, vector<8x16xf32>
    %27 = vector.extract_strided_slice %26 {offsets = [0, 4], sizes = [8, 12], strides = [1, 1]} : vector<8x16xf32> to vector<8x12xf32>
    %28 = vector.extract_strided_slice %26 {offsets = [0, 0], sizes = [8, 4], strides = [1, 1]} : vector<8x16xf32> to vector<8x4xf32>
    %29 = tpu.concatenate %27, %28 in 1 : vector<8x12xf32>, vector<8x4xf32> -> vector<8x16xf32>
    %c2_i32 = arith.constant 2 : i32
    %30 = vector.broadcast %c2_i32 : i32 to vector<8x16xi32>
    %31 = arith.shrsi %6, %30 : vector<8x16xi32>
    %c1_i32_10 = arith.constant 1 : i32
    %32 = vector.broadcast %c1_i32_10 : i32 to vector<8x16xi32>
    %33 = arith.andi %31, %32 : vector<8x16xi32>
    %c1_i32_11 = arith.constant 1 : i32
    %34 = vector.broadcast %c1_i32_11 : i32 to vector<8x16xi32>
    %35 = arith.cmpi eq, %33, %34 : vector<8x16xi32>
    %36 = arith.select %35, %29, %26 : vector<8x16xi1>, vector<8x16xf32>
    %37 = vector.extract_strided_slice %36 {offsets = [0, 0], sizes = [8, 8], strides = [1, 1]} : vector<8x16xf32> to vector<8x8xf32>
    %cst_12 = arith.constant 2.000000e+00 : f32
    %38 = vector.broadcast %cst_12 : f32 to vector<8x8xf32>
    %39 = arith.subf %37, %38 : vector<8x8xf32>
    %40 = math.exp %39 : vector<8x8xf32>
    %c8_i32 = arith.constant 8 : i32
    %41 = arith.muli %arg1, %c8_i32 : i32
    %42 = tpu.iota {dimensions = array<i32: 0>} : vector<8x8xi32>
    %43 = vector.broadcast %41 : i32 to vector<8x8xi32>
    %44 = arith.addi %43, %42 : vector<8x8xi32>
    %c0_i32_13 = arith.constant 0 : i32
    %45 = arith.cmpi eq, %arg1, %c0_i32_13 : i32
    %46 = arith.extui %45 : i1 to i32
    %c0_i32_14 = arith.constant 0 : i32
    %47 = arith.cmpi ne, %46, %c0_i32_14 : i32
    scf.if %47 {
      %cst_30 = arith.constant 0.000000e+00 : f32
      %76 = vector.broadcast %cst_30 : f32 to vector<2x8xf32>
      %c0_31 = arith.constant 0 : index
      %c0_32 = arith.constant 0 : index
      %77 = vector.load %arg6[%c0_31, %c0_32] : memref<2x8xf32, #tpu.memory_space<vmem>>, vector<2x8xf32>
      tpu.vector_store %arg6[%c0_31, %c0_32], %76 {strides = array<i32>} : memref<2x8xf32, #tpu.memory_space<vmem>>, vector<2x8xf32>,
    } else {
    }
    %c0_15 = arith.constant 0 : index
    %c0_16 = arith.constant 0 : index
    %48 = vector.load %arg5[%c0_15, %c0_16] : memref<2x8xi32, #tpu.memory_space<vmem>>, vector<1x8xi32>
    %49 = vector.shape_cast %48 : vector<1x8xi32> to vector<8xi32>
    %50 = vector.shape_cast %49 : vector<8xi32> to vector<1x8xi32>
    %51 = vector.broadcast %50 : vector<1x8xi32> to vector<8x8xi32>
    %52 = arith.cmpi slt, %44, %51 : vector<8x8xi32>
    %cst_17 = arith.constant 0.000000e+00 : f32
    %53 = vector.broadcast %cst_17 : f32 to vector<8x8xf32>
    %54 = arith.select %52, %40, %53 : vector<8x8xi1>, vector<8x8xf32>
    %cst_18 = arith.constant dense<0.000000e+00> : vector<8xf32>
    %55 = vector.multi_reduction <add>, %54, %cst_18 [0] : vector<8x8xf32> to vector<8xf32>
    %c0_19 = arith.constant 0 : index
    %c0_20 = arith.constant 0 : index
    %56 = vector.load %arg6[%c0_19, %c0_20] : memref<2x8xf32, #tpu.memory_space<vmem>>, vector<1x8xf32>
    %57 = vector.shape_cast %56 : vector<1x8xf32> to vector<8xf32>
    %58 = arith.addf %57, %55 : vector<8xf32>
    %c0_21 = arith.constant 0 : index
    %c0_22 = arith.constant 0 : index
    %59 = vector.load %arg6[%c0_21, %c0_22] : memref<2x8xf32, #tpu.memory_space<vmem>>, vector<1x8xf32>
    %60 = vector.shape_cast %59 : vector<1x8xf32> to vector<8xf32>
    %61 = vector.shape_cast %58 : vector<8xf32> to vector<1x8xf32>
    tpu.vector_store %arg6[%c0_21, %c0_22], %61 {strides = array<i32>} : memref<2x8xf32, #tpu.memory_space<vmem>>, vector<1x8xf32>,
    %c1 = arith.constant 1 : index
    %c0_23 = arith.constant 0 : index
    %62 = vector.load %arg5[%c1, %c0_23] : memref<2x8xi32, #tpu.memory_space<vmem>>, vector<1x8xi32>
    %63 = vector.shape_cast %62 : vector<1x8xi32> to vector<8xi32>
    %64 = vector.shape_cast %63 : vector<8xi32> to vector<1x8xi32>
    %65 = vector.broadcast %64 : vector<1x8xi32> to vector<8x8xi32>
    %66 = arith.cmpi slt, %44, %65 : vector<8x8xi32>
    %cst_24 = arith.constant 0.000000e+00 : f32
    %67 = vector.broadcast %cst_24 : f32 to vector<8x8xf32>
    %68 = arith.select %66, %40, %67 : vector<8x8xi1>, vector<8x8xf32>
    %cst_25 = arith.constant dense<0.000000e+00> : vector<8xf32>
    %69 = vector.multi_reduction <add>, %68, %cst_25 [0] : vector<8x8xf32> to vector<8xf32>
    %c1_26 = arith.constant 1 : index
    %c0_27 = arith.constant 0 : index
    %70 = vector.load %arg6[%c1_26, %c0_27] : memref<2x8xf32, #tpu.memory_space<vmem>>, vector<1x8xf32>
    %71 = vector.shape_cast %70 : vector<1x8xf32> to vector<8xf32>
    %72 = arith.addf %71, %69 : vector<8xf32>
    %c1_28 = arith.constant 1 : index
    %c0_29 = arith.constant 0 : index
    %73 = vector.load %arg6[%c1_28, %c0_29] : memref<2x8xf32, #tpu.memory_space<vmem>>, vector<1x8xf32>
    %74 = vector.shape_cast %73 : vector<1x8xf32> to vector<8xf32>
    %75 = vector.shape_cast %72 : vector<8xf32> to vector<1x8xf32>
    tpu.vector_store %arg6[%c1_28, %c0_29], %75 {strides = array<i32>} : memref<2x8xf32, #tpu.memory_space<vmem>>, vector<1x8xf32>,
    return
  }
  func.func @transform_0(%arg0: i32, %arg1: i32) -> (i32, i32) {
    %c0_i32 = arith.constant 0 : i32
    %c0_i32_0 = arith.constant 0 : i32
    return %arg1, %c0_i32 : i32, i32
  }
  func.func @transform_1(%arg0: i32, %arg1: i32) -> (i32, i32) {
    %0 = arith.addi %arg1, %arg0 : i32
    %c1_i32 = arith.constant 1 : i32
    %c0_i32 = arith.constant 0 : i32
    %1 = arith.cmpi eq, %c1_i32, %c0_i32 : i32
    %c1_i32_0 = arith.constant 1 : i32
    %2 = arith.select %1, %c1_i32_0, %c1_i32 : i32
    %3 = arith.remsi %0, %2 : i32
    %c0_i32_1 = arith.constant 0 : i32
    %4 = arith.cmpi ne, %3, %c0_i32_1 : i32
    %c0_i32_2 = arith.constant 0 : i32
    %5 = arith.cmpi slt, %3, %c0_i32_2 : i32
    %c0_i32_3 = arith.constant 0 : i32
    %6 = arith.cmpi slt, %2, %c0_i32_3 : i32
    %7 = arith.xori %5, %6 : i1
    %8 = arith.andi %7, %4 : i1
    %9 = arith.addi %3, %2 : i32
    %10 = arith.select %8, %9, %3 : i32
    %c0_i32_4 = arith.constant 0 : i32
    %c0_i32_5 = arith.constant 0 : i32
    return %10, %c0_i32_4 : i32, i32
  }
  func.func @transform_2(%arg0: i32, %arg1: i32) -> (i32, i32) {
    %0 = arith.addi %arg1, %arg0 : i32
    %c1_i32 = arith.constant 1 : i32
    %1 = arith.addi %0, %c1_i32 : i32
    %c1_i32_0 = arith.constant 1 : i32
    %c0_i32 = arith.constant 0 : i32
    %2 = arith.cmpi eq, %c1_i32_0, %c0_i32 : i32
    %c1_i32_1 = arith.constant 1 : i32
    %3 = arith.select %2, %c1_i32_1, %c1_i32_0 : i32
    %4 = arith.remsi %1, %3 : i32
    %c0_i32_2 = arith.constant 0 : i32
    %5 = arith.cmpi ne, %4, %c0_i32_2 : i32
    %c0_i32_3 = arith.constant 0 : i32
    %6 = arith.cmpi slt, %4, %c0_i32_3 : i32
    %c0_i32_4 = arith.constant 0 : i32
    %7 = arith.cmpi slt, %3, %c0_i32_4 : i32
    %8 = arith.xori %6, %7 : i1
    %9 = arith.andi %8, %5 : i1
    %10 = arith.addi %4, %3 : i32
    %11 = arith.select %9, %10, %4 : i32
    %c0_i32_5 = arith.constant 0 : i32
    %c0_i32_6 = arith.constant 0 : i32
    return %11, %c0_i32_5 : i32, i32
  }
  func.func @transform_3(%arg0: i32, %arg1: i32) -> (i32, i32) {
    %c0_i32 = arith.constant 0 : i32
    %c0_i32_0 = arith.constant 0 : i32
    return %c0_i32, %arg0 : i32, i32
  }
  func.func @transform_4(%arg0: i32, %arg1: i32) -> (i32, i32) {
    %c0_i32 = arith.constant 0 : i32
    %c0_i32_0 = arith.constant 0 : i32
    return %c0_i32, %arg0 : i32, i32
  }
}

</mosaic_0001>

<bundles_post_ra>
// kernel: mul.0
= control target key start
LH: loop header
LB: loop body
LE: loop exit
PB: predicated region body
PF: predicated region fallthrough
CT: control target
= control target key end

     0   :  { %s34_s0 = inlined_call_operand.vmem [shape: f32[24], index: 0, kind: input, shape index: {}]   ;;  %s35_s1 = inlined_call_operand.vmem [shape: f32[24], index: 1, kind: input, shape index: {}]   ;;  %s36_s2 = inlined_call_operand.vmem [shape: f32[24], index: 2, kind: output, shape index: {}]  }
   0x1   :  { %v3_v0 = vld [vmem:[%s34_s0] sm:$0x1] }
   0x2   :  { %v4_v1 = vld [vmem:[%s35_s1] sm:$0x1] }
   0x3   :  { %v7_v2 = vmul.f32 %v4_v1, %v3_v0 }
   0x5   :  { %9 = vst [vmem:[%s36_s2] sm:$0x1] %v7_v2 }

// kernel: nt_cross_entropy_loss.2
= control target key start
LH: loop header
LB: loop body
LE: loop exit
PB: predicated region body
PF: predicated region fallthrough
CT: control target
= control target key end

     0   :  { %vm10_vm0 = vcmask 261120   ;;  %s41_s0 = inlined_call_operand.vmem [shape: f32[8,32], index: 0, kind: input, shape index: {}]   ;;  %s42_s1 = inlined_call_operand.vmem [shape: f32[8,32], index: 1, kind: output, shape index: {}]  }
   0x1   :  { %v8_v0 = vld [vmem:[%s41_s0] sm:$0xff] }
   0x2   :  { %v9_v1 = vmul.f32 %v8_v0, %v8_v0 }
   0x4   :  { %v11_v2 = vsel %vm10_vm0, %v9_v1, 0.0 }
   0x5   :  { %12 = vadd.xlane.f32.xlu0 %v11_v2 }
  0x92   :  { %v13_v3 = vpop.xlane.xlu0 %12 }
  0x93   :  { %v14_v4 = vmax.f32 %v13_v3, 1e-16 }
  0x95   :  { %23 = vrsqrt.f32 %v14_v4 }
  0x9f   :  { %v24_v5 = vpop.eup %23 }
  0xa0   :  { %v16_v6 = vmul.f32 1.4142135, %v24_v5 }
  0xa2   :  { %v17_v7 = vmul.f32 %v16_v6, %v8_v0 }
  0xa4   :  { %18 = vst.msk [vmem:[%s42_s1] sm:$0xff] %vm10_vm0, %v17_v7 }

// kernel: nt_cross_entropy_loss.3
= control target key start
LH: loop header
LB: loop body
LE: loop exit
PB: predicated region body
PF: predicated region fallthrough
CT: control target
= control target key end

     0   :  { %vm226_vm0 = vcmask 58368   ;;  %vm19_vm1 = vcmask 261120   ;;  %v299_v0 = vmov 0.0   ;;  %vm300_vm2 = vmmov 0   ;;  %s304_s23 = smov 14   ;;  %s305_s24 = smov 126   ;;  %s370_s4 = inlined_call_operand.vmem [shape: f32[2,8], index: 4, kind: output, shape index: {}]   ;;  %s371_s2 = inlined_call_operand.vmem [shape: f32[8,32], index: 2, kind: input, shape index: {}, may-alias: {0,1,2}]   ;;  %s372_s0 = inlined_call_operand.vmem [shape: f32[8,32], index: 0, kind: input, shape index: {}, may-alias: {0,1,2}]   ;;  %s373_s1 = inlined_call_operand.vmem [shape: f32[8,32], index: 1, kind: input, shape index: {}, may-alias: {0,1,2}]   ;;  %s374_s3 = inlined_call_operand.vmem [shape: s32[2,8], index: 3, kind: input, shape index: {}]  }
   0x1   :  { %283 = vmatprep.subr.mxu1 %v299_v0  ;;  %227 = vst.msk [vmem:[%s370_s4] sm:$0x3] %vm226_vm0, %v299_v0  ;;  %v96_v1 = vld [vmem:[%s371_s2] sm:$0xff]  ;;  %285 = vmatprep.mubr.msk.f32.mxu1 %vm300_vm2, %v299_v0  ;;  %s301_s2 = smov 8   ;;  %vm174_vm3 = vcmask 64512   ;;  %v176_v10 = vlaneseq  ;;  %vm185_vm4 = vcmask 121856  }
   0x2   :  { %v18_v2 = vld [vmem:[%s373_s1] sm:$0xff]  ;;  %284 = vmatpush3.xpose.msk.msra.mxu1 %vm19_vm1, %v96_v1  ;;  %278 = vmatprep.subr.mxu0 %v299_v0  ;;  %s302_s1 = smov 15   ;;  %vm197_vm6 = vcmask 113664   ;;  %s306_s25 = smov 12   ;;  %vm210_vm8 = vcmask 97280   ;;  %vm244_vm12 = vcmask 57344  }
   0x3   :  { %v17_v3 = vld [vmem:[%s372_s0] sm:$0xff]  ;;  %279 = vmatpush3.xpose.msk.msra.mxu0 %vm19_vm1, %v18_v2  ;;  %280 = vmatprep.mubr.msk.f32.mxu0 %vm300_vm2, %v299_v0  ;;  %s303_s0 = smov 127   ;;  %v177_v11 = vshrl.u32 %v176_v10, 7  ;;  %s307_s26 = smov 124  }
   0x4   :  { %v272_v31 = vld [vmem:[%s374_s3] ss:$0 sm:$0xff]  ;;  %v273_v32 = vld [vmem:[%s374_s3 + $0x1] ss:$0 sm:$0xff] }
   0x5   :  { %286 = vmatmul.mubr.msk.f32.vlgmr.msra.gmra.mrb[0].mxu1 %vm19_vm1, %v17_v3  ;;  %v187_v12 = vand.u32 1, %v177_v11  ;;  %v199_v17 = vshra.s32 %v177_v11, 1  ;;  %v212_v23 = vshra.s32 %v177_v11, 2  ;;  %vm233_vm10 = vcmp.lt.s32.totalorder %v177_v11, %v272_v31 }
   0x6   :  { %281 = vmatmul.mubr.msk.f32.vlgmr.msra.gmra.mrb[0].mxu0 %vm19_vm1, %v17_v3  ;;  %vm251_vm11 = vcmp.lt.s32.totalorder %v177_v11, %v273_v32 }
   0x7   :  { %vm188_vm5 = vcmp.eq.s32.totalorder %v187_v12, 1  ;;  %v200_v18 = vand.u32 1, %v199_v17  ;;  %v213_v24 = vand.u32 1, %v212_v23 }
   0x8   :  { %v242_v48 = vld [vmem:[%s370_s4] sm:$0x1]  ;;  %v260_v49 = vld [vmem:[%s370_s4 + $0x1] sm:$0x1] }
   0x9   :  { %vm201_vm7 = vcmp.eq.s32.totalorder %v200_v18, 1  ;;  %vm214_vm9 = vcmp.eq.s32.totalorder %v213_v24, 1 }
  0xd8   :  { %v166_v4 = vpop.f32.mrb[0].mxu1 }
  0xd9   :  { %171 = vrot.lane.b32.xlu0 %v166_v4, %s301_s2  ;;  %v287_v5 = vpop.f32.mrb[1].mxu1  ;;  %v92_v6 = vpop.f32.mrb[0].mxu0 }
  0xda   :  { %v282_v7 = vpop.f32.mrb[1].mxu0 }
 0x14b   :  { %v172_v8 = vpop.permute.xlu0 %171 }
 0x14c   :  { %v175_v9 = vsel %vm174_vm3, %v92_v6, %v172_v8 }
 0x14d   :  { %182 = vrot.lane.b32.xlu1 %v175_v9, %s302_s1  ;;  %179 = vrot.lane.b32.xlu0 %v175_v9, %s303_s0 }
 0x1bf   :  { %v183_v13 = vpop.permute.xlu1 %182  ;;  %v180_v14 = vpop.permute.xlu0 %179 }
 0x1c0   :  { %v186_v15 = vsel %vm185_vm4, %v180_v14, %v183_v13 }
 0x1c1   :  { %v189_v16 = vsel %vm188_vm5, %v186_v15, %v175_v9 }
 0x1c2   :  { %194 = vrot.lane.b32.xlu0 %v189_v16, %s304_s23  ;;  %191 = vrot.lane.b32.xlu1 %v189_v16, %s305_s24 }
 0x234   :  { %v195_v19 = vpop.permute.xlu0 %194  ;;  %v192_v20 = vpop.permute.xlu1 %191 }
 0x235   :  { %v198_v21 = vsel %vm197_vm6, %v192_v20, %v195_v19 }
 0x236   :  { %v202_v22 = vsel %vm201_vm7, %v198_v21, %v189_v16 }
 0x237   :  { %207 = vrot.lane.b32.xlu0 %v202_v22, %s306_s25  ;;  %204 = vrot.lane.b32.xlu1 %v202_v22, %s307_s26 }
 0x2a9   :  { %v208_v25 = vpop.permute.xlu0 %207  ;;  %v205_v26 = vpop.permute.xlu1 %204 }
 0x2aa   :  { %v211_v27 = vsel %vm210_vm8, %v205_v26, %v208_v25 }
 0x2ab   :  { %v215_v28 = vsel %vm214_vm9, %v211_v27, %v202_v22 }
 0x2ac   :  { %v271_v29 = vadd.f32 -2.0, %v215_v28 }
 0x2ae   :  { %v217_v30 = vmul.f32 1.442695, %v271_v29 }
 0x2b0   :  { %297 = vpow2.f32 %v217_v30 }
 0x2ba   :  { %v298_v33 = vpop.eup %297 }
 0x2bb   :  { %v234_v34 = vsel %vm233_vm10, %v298_v33, 0.0  ;;  %v252_v35 = vsel %vm251_vm11, %v298_v33, 0.0 }
 0x2bc   :  { %v235_v36 = vsel %vm174_vm3, %v234_v34, 0.0  ;;  %v253_v37 = vsel %vm174_vm3, %v252_v35, 0.0 }
 0x2bd   :  { %v236_v38 = vrot.slane %v235_v36, 4  ;;  %v254_v39 = vrot.slane %v253_v37, 4 }
 0x2bf   :  { %v237_v40 = vadd.f32 %v236_v38, %v235_v36  ;;  %v255_v41 = vadd.f32 %v254_v39, %v253_v37 }
 0x2c1   :  { %v238_v42 = vrot.slane %v237_v40, 2  ;;  %v256_v43 = vrot.slane %v255_v41, 2 }
 0x2c3   :  { %v239_v44 = vadd.f32 %v238_v42, %v237_v40  ;;  %v257_v45 = vadd.f32 %v256_v43, %v255_v41 }
 0x2c5   :  { %v240_v46 = vrot.slane %v239_v44, 1  ;;  %v258_v47 = vrot.slane %v257_v45, 1 }
 0x2c7   :  { %v241_v50 = vadd.f32 %v240_v46, %v239_v44  ;;  %v259_v51 = vadd.f32 %v258_v47, %v257_v45 }
 0x2c9   :  { %v243_v52 = vadd.f32 %v242_v48, %v241_v50  ;;  %v261_v53 = vadd.f32 %v260_v49, %v259_v51 }
 0x2cb   :  { %245 = vst.msk [vmem:[%s370_s4] sm:$0x1] %vm244_vm12, %v243_v52  ;;  %262 = vst.msk [vmem:[%s370_s4 + $0x1] sm:$0x1] %vm244_vm12, %v261_v53 }

</bundles_post_ra>
